<compile_context>
chip_gen: v7x
topology: tpu7x:2x2x1
jax: 0.10.0
libtpu: 0.0.40
codegen_flags: <defaults>
</compile_context>

<pallas_src>
import functools

import jax
import jax.numpy as jnp
from jax.experimental import pallas as pl
from jax.experimental.pallas import tpu as pltpu

EPS = 1e-5
LANE = 128           # lane width; tiling granularity for C_out and C_in
MAX_SINGLE_K = 2048  # padded C_in <= this => keep x fully resident (single K step)


def _round_up(v, m):
    return ((v + m - 1) // m) * m


def _tpu_defaults():
    """(tile_c, vmem_cap_bytes) chosen per TPU generation; conservative fallback."""
    kind = ""
    try:
        kind = jax.devices()[0].device_kind.lower()
    except Exception:
        pass
    if "v6" in kind:                       # v6e: 2x256 MXU, 128 MiB VMEM
        return 256, 100 << 20
    if "7x" in kind or "v7" in kind:       # v7x: 2x256 MXU, 64 MiB VMEM
        return 256, 48 << 20
    if "v5" in kind:                       # v5e/v5p: 128-wide MXU, 128 MiB VMEM
        return 128, 100 << 20
    return 128, 48 << 20                   # unknown: safe everywhere


def _bn_epilogue(y, gb_ref, o_ref, apply_relu):
    """Fused one-pass BatchNorm epilogue on the (N, tile_c) f32 slab `y`."""
    n = y.shape[0]
    inv_n = 1.0 / n

    sum_y = jnp.sum(y, axis=0, keepdims=True)                 # (1, tile_c)
    sum_y2 = jnp.sum(y * y, axis=0, keepdims=True)            # (1, tile_c)
    mean = sum_y * inv_n
    # One-pass variance; clamp tiny negative cancellation before rsqrt.
    var = jnp.maximum(sum_y2 * inv_n - mean * mean, 0.0)

    gb = gb_ref[...]                                           # (2, tile_c) f32
    gamma = gb[0:1, :]
    beta = gb[1:2, :]

    scale = gamma * jax.lax.rsqrt(var + EPS)                   # (1, tile_c)
    shift = beta - mean * scale                                # (1, tile_c)

    out = y * scale + shift                                    # single mul+add pass
    if apply_relu:
        out = jnp.maximum(out, 0.0)
    o_ref[...] = out.astype(o_ref.dtype)


def _linear_bn_kernel_resident(x_ref, wt_ref, gb_ref, o_ref, *, apply_relu):
    # Single K step: x fully resident. MXU matmul with f32 accumulation.
    y = jnp.dot(x_ref[...], wt_ref[...], preferred_element_type=jnp.float32)
    _bn_epilogue(y, gb_ref, o_ref, apply_relu)


def _linear_bn_kernel_ktiled(x_ref, wt_ref, gb_ref, o_ref, acc_ref, *, apply_relu):
    # K-tiled reduction over C_in with an f32 VMEM accumulator.
    k = pl.program_id(1)

    @pl.when(k == 0)
    def _():
        acc_ref[...] = jnp.zeros_like(acc_ref)

    acc_ref[...] += jnp.dot(x_ref[...], wt_ref[...], preferred_element_type=jnp.float32)

    @pl.when(k == pl.num_programs(1) - 1)
    def _():
        _bn_epilogue(acc_ref[...], gb_ref, o_ref, apply_relu)


def prepare_linear_bn_params(weight, gamma, beta, *, tile_c=None, tile_k=None,
                             matmul_dtype=jnp.bfloat16):
    """One-time parameter prep (do at model init, not per forward call).

    weight: (C_out, C_in) torch-Linear layout; gamma/beta: (C_out,).
    Returns a dict with the transposed/padded/bf16 weight, the stacked (2, C_pad)
    gamma/beta, and all tiling metadata. Padded channels carry w=0, gamma=0, beta=0
    so they produce exactly 0; padded C_in columns are zero so stats are unchanged.
    """
    c_out, c_in = weight.shape
    gen_tile_c, vmem_cap = _tpu_defaults()

    if tile_c is None:
        tile_c = min(gen_tile_c, _round_up(c_out, LANE))
    assert tile_c % LANE == 0
    c_pad = _round_up(c_out, tile_c)

    c_in_128 = _round_up(c_in, LANE)
    if tile_k is None:
        tile_k = c_in_128 if c_in_128 <= MAX_SINGLE_K else 512
    assert tile_k % LANE == 0
    c_in_pad = _round_up(c_in_128, tile_k)
    num_k = c_in_pad // tile_k

    wt = jnp.transpose(weight.astype(jnp.float32))                       # (C_in, C_out)
    wt = jnp.pad(wt, ((0, c_in_pad - c_in), (0, c_pad - c_out)))
    wt = wt.astype(matmul_dtype)                                         # cast once here

    gb = jnp.stack([
        jnp.pad(gamma.astype(jnp.float32), (0, c_pad - c_out)),
        jnp.pad(beta.astype(jnp.float32), (0, c_pad - c_out)),
    ])                                                                   # (2, C_pad)

    return dict(wt=wt, gb=gb, c_out=c_out, c_in=c_in, c_in_pad=c_in_pad, c_pad=c_pad,
                tile_c=tile_c, tile_k=tile_k, num_k=num_k,
                matmul_dtype=matmul_dtype, vmem_cap=vmem_cap)


def _vmem_limit_bytes(n, tile_k, tile_c, num_k, in_bytes, out_bytes, cap):
    step = (
        2 * n * tile_k * in_bytes            # x tile (double-buffered)
        + 2 * tile_k * tile_c * in_bytes     # weight tile (double-buffered)
        + 2 * 2 * tile_c * 4                 # gamma/beta tile (double-buffered)
        + 2 * n * tile_c * out_bytes         # output tile (double-buffered)
        + (n * tile_c * 4 if num_k > 1 else 0)   # f32 accumulator scratch
        + 2 * n * tile_c * 4                 # f32 y / epilogue intermediates
    )
    # 2x headroom for compiler temporaries; clamp to the per-generation cap.
    return int(min(cap, max(32 << 20, 2 * step)))


def _linear_bn_padded(x, params, *, act_relu):
    """x: (N, C_in). Returns (N, C_pad); padded channels are exactly 0."""
    n, c_in = x.shape
    assert c_in == params["c_in"], "x feature dim does not match prepared params"

    wt, gb = params["wt"], params["gb"]
    c_in_pad, c_pad = params["c_in_pad"], params["c_pad"]
    tile_c, tile_k, num_k = params["tile_c"], params["tile_k"], params["num_k"]

    # Cast x to the matmul dtype once and pad C_in to the lane/tile boundary.
    x_in = x.astype(params["matmul_dtype"])
    if c_in_pad != c_in:
        x_in = jnp.pad(x_in, ((0, 0), (0, c_in_pad - c_in)))

    in_bytes = jnp.dtype(params["matmul_dtype"]).itemsize
    out_bytes = jnp.dtype(x.dtype).itemsize
    vmem_limit = _vmem_limit_bytes(n, tile_k, tile_c, num_k, in_bytes, out_bytes,
                                   params["vmem_cap"])

    if num_k == 1:
        kernel = functools.partial(_linear_bn_kernel_resident, apply_relu=act_relu)
        grid = (c_pad // tile_c,)
        in_specs = [
            pl.BlockSpec((n, c_in_pad), lambda j: (0, 0)),        # x resident
            pl.BlockSpec((c_in_pad, tile_c), lambda j: (0, j)),   # weight column tile
            pl.BlockSpec((2, tile_c), lambda j: (0, j)),          # gamma/beta tile
        ]
        out_specs = pl.BlockSpec((n, tile_c), lambda j: (0, j))
        scratch = []
        dims = ("parallel",)
    else:
        kernel = functools.partial(_linear_bn_kernel_ktiled, apply_relu=act_relu)
        grid = (c_pad // tile_c, num_k)
        in_specs = [
            pl.BlockSpec((n, tile_k), lambda j, k: (0, k)),
            pl.BlockSpec((tile_k, tile_c), lambda j, k: (k, j)),
            pl.BlockSpec((2, tile_c), lambda j, k: (0, j)),
        ]
        out_specs = pl.BlockSpec((n, tile_c), lambda j, k: (0, j))
        scratch = [pltpu.VMEM((n, tile_c), jnp.float32)]
        dims = ("parallel", "arbitrary")

    return pl.pallas_call(
        kernel,
        out_shape=jax.ShapeDtypeStruct((n, c_pad), x.dtype),
        grid_spec=pltpu.PrefetchScalarGridSpec(
            num_scalar_prefetch=0,
            grid=grid,
            in_specs=in_specs,
            out_specs=out_specs,
            scratch_shapes=scratch,
        ),
        compiler_params=pltpu.CompilerParams(
            dimension_semantics=dims,
            vmem_limit_bytes=vmem_limit,
        ),
    )(x_in, wt, gb)


def linear_bn(x, params, *, act_relu=True):
    """Public wrapper: (N, C_in) -> (N, C_out)."""
    return _linear_bn_padded(x, params, act_relu=act_relu)[:, :params["c_out"]]


def linear_bn_reference(x, weight, gamma, beta, *, act_relu=True):
    y = x @ weight.T
    mean = jnp.mean(y, axis=0, keepdims=True)
    var = jnp.mean((y - mean) ** 2, axis=0, keepdims=True)  # biased, torch train-mode BN
    out = (y - mean) / jnp.sqrt(var + EPS) * gamma[None, :] + beta[None, :]
    if act_relu:
        out = jnp.maximum(out, 0.0)
    return out


if __name__ == "__main__":
    key = jax.random.PRNGKey(0)

    def run_case(case_key, n, c_in, c_out, tile_k=None):
        k_x, k_w, k_g, k_b = jax.random.split(case_key, 4)
        x = jax.random.normal(k_x, (n, c_in), dtype=jnp.float32)

        # nn.Linear(in, out, bias=False): weight (out, in), U(-1/sqrt(in), 1/sqrt(in)).
        bound = 1.0 / (c_in ** 0.5)
        weight = jax.random.uniform(k_w, (c_out, c_in), dtype=jnp.float32,
                                    minval=-bound, maxval=bound)
        # Non-trivial BN affine so the folded scale/shift path is exercised.
        gamma = 1.0 + 0.1 * jax.random.normal(k_g, (c_out,), dtype=jnp.float32)
        beta = 0.1 * jax.random.normal(k_b, (c_out,), dtype=jnp.float32)

        params = prepare_linear_bn_params(weight, gamma, beta, tile_k=tile_k)
        out_padded = jax.block_until_ready(_linear_bn_padded(x, params, act_relu=True))
        out = out_padded[:, :c_out]

        # f32 reference (loose tol absorbs the bf16 matmul operands) and a
        # bf16-rounded-operand reference (tight tol catches algorithmic bugs).
        ref_f32 = linear_bn_reference(x, weight, gamma, beta, act_relu=True)
        ref_bf16 = linear_bn_reference(
            x.astype(jnp.bfloat16).astype(jnp.float32),
            weight.astype(jnp.bfloat16).astype(jnp.float32),
            gamma, beta, act_relu=True)

        assert out.shape == (n, c_out)
        assert jnp.allclose(out, ref_f32, atol=3e-2, rtol=3e-2), "mismatch vs f32 reference"
        assert jnp.allclose(out, ref_bf16, atol=3e-3, rtol=3e-3), "mismatch vs bf16-operand reference"
        assert jnp.all(out_padded[:, c_out:] == 0.0), "padding lanes not clean"
        assert bool(jnp.all(jnp.isfinite(out_padded))), "non-finite output"

    k1, k2 = jax.random.split(key)
    # Spec-scale small case: single-K resident path (C_in padded 32 -> 128, one K step).
    run_case(k1, n=8, c_in=32, c_out=64)
    # Small case forcing the K-tiled accumulator path (C_in=256, tile_k=128 -> 2 K steps).
    run_case(k2, n=16, c_in=256, c_out=192, tile_k=128)

    print("KERNEL_OK")
</pallas_src>

<mosaic_0001>
module attributes {stable_mosaic.version = 11 : i64} {
  func.func @_linear_bn_kernel_resident(%arg0: i32, %arg1: memref<8x128xbf16, #tpu.memory_space<vmem>>, %arg2: memref<128x128xbf16, #tpu.memory_space<vmem>>, %arg3: memref<2x128xf32, #tpu.memory_space<vmem>>, %arg4: memref<8x128xf32, #tpu.memory_space<vmem>>) attributes {dimension_semantics = [#tpu.dimension_semantics<parallel>], iteration_bounds = array<i64: 1>, scalar_prefetch = 0 : i64, scratch_operands = 0 : i64, tpu.core_type = #tpu.core_type<tc>, window_params = [{pipeline_mode = #tpu.pipeline_mode<synchronous>, transform_indices = @transform_0, window_bounds = array<i64: 8, 128>}, {transform_indices = @transform_1, window_bounds = array<i64: 128, 128>}, {transform_indices = @transform_2, window_bounds = array<i64: 2, 128>}, {transform_indices = @transform_3, window_bounds = array<i64: 8, 128>}]} {
    %c0 = arith.constant 0 : index
    %c0_0 = arith.constant 0 : index
    %0 = vector.load %arg1[%c0, %c0_0] : memref<8x128xbf16, #tpu.memory_space<vmem>>, vector<8x128xbf16>
    %c0_1 = arith.constant 0 : index
    %c0_2 = arith.constant 0 : index
    %1 = vector.load %arg2[%c0_1, %c0_2] : memref<128x128xbf16, #tpu.memory_space<vmem>>, vector<128x128xbf16>
    %cst = arith.constant dense<0.000000e+00> : vector<8x128xf32>
    %2 = tpu.matmul %0, %1, %cst {dimension_numbers = #tpu.dot_dimension_numbers<[1], [0], [0], [1], [0, 0, 1, 1], [], []>} : vector<8x128xbf16>, vector<128x128xbf16>, vector<8x128xf32> -> vector<8x128xf32>
    %cst_3 = arith.constant dense<0.000000e+00> : vector<128xf32>
    %3 = vector.multi_reduction <add>, %2, %cst_3 [0] : vector<8x128xf32> to vector<128xf32>
    %4 = vector.shape_cast %3 : vector<128xf32> to vector<1x128xf32>
    %5 = arith.mulf %2, %2 : vector<8x128xf32>
    %cst_4 = arith.constant dense<0.000000e+00> : vector<128xf32>
    %6 = vector.multi_reduction <add>, %5, %cst_4 [0] : vector<8x128xf32> to vector<128xf32>
    %7 = vector.shape_cast %6 : vector<128xf32> to vector<1x128xf32>
    %cst_5 = arith.constant 1.250000e-01 : f32
    %8 = vector.broadcast %cst_5 : f32 to vector<1x128xf32>
    %9 = arith.mulf %4, %8 : vector<1x128xf32>
    %cst_6 = arith.constant 1.250000e-01 : f32
    %10 = vector.broadcast %cst_6 : f32 to vector<1x128xf32>
    %11 = arith.mulf %7, %10 : vector<1x128xf32>
    %12 = arith.mulf %9, %9 : vector<1x128xf32>
    %13 = arith.subf %11, %12 : vector<1x128xf32>
    %cst_7 = arith.constant 0.000000e+00 : f32
    %14 = vector.broadcast %cst_7 : f32 to vector<1x128xf32>
    %15 = arith.maximumf %13, %14 : vector<1x128xf32>
    %c0_8 = arith.constant 0 : index
    %c0_9 = arith.constant 0 : index
    %16 = vector.load %arg3[%c0_8, %c0_9] : memref<2x128xf32, #tpu.memory_space<vmem>>, vector<2x128xf32>
    %17 = vector.extract_strided_slice %16 {offsets = [0, 0], sizes = [1, 128], strides = [1, 1]} : vector<2x128xf32> to vector<1x128xf32>
    %18 = vector.extract_strided_slice %16 {offsets = [1, 0], sizes = [1, 128], strides = [1, 1]} : vector<2x128xf32> to vector<1x128xf32>
    %cst_10 = arith.constant 9.99999974E-6 : f32
    %19 = vector.broadcast %cst_10 : f32 to vector<1x128xf32>
    %20 = arith.addf %15, %19 : vector<1x128xf32>
    %21 = math.rsqrt %20 : vector<1x128xf32>
    %22 = arith.mulf %17, %21 : vector<1x128xf32>
    %23 = arith.mulf %9, %22 : vector<1x128xf32>
    %24 = arith.subf %18, %23 : vector<1x128xf32>
    %25 = vector.broadcast %22 : vector<1x128xf32> to vector<8x128xf32>
    %26 = arith.mulf %2, %25 : vector<8x128xf32>
    %27 = vector.broadcast %24 : vector<1x128xf32> to vector<8x128xf32>
    %28 = arith.addf %26, %27 : vector<8x128xf32>
    %cst_11 = arith.constant 0.000000e+00 : f32
    %29 = vector.broadcast %cst_11 : f32 to vector<8x128xf32>
    %30 = arith.maximumf %28, %29 : vector<8x128xf32>
    %c0_12 = arith.constant 0 : index
    %c0_13 = arith.constant 0 : index
    %31 = vector.load %arg4[%c0_12, %c0_13] : memref<8x128xf32, #tpu.memory_space<vmem>>, vector<8x128xf32>
    tpu.vector_store %arg4[%c0_12, %c0_13], %30 {strides = array<i32>} : memref<8x128xf32, #tpu.memory_space<vmem>>, vector<8x128xf32>,
    return
  }
  func.func @transform_0(%arg0: i32) -> (i32, i32) {
    %c0_i32 = arith.constant 0 : i32
    %c0_i32_0 = arith.constant 0 : i32
    %c0_i32_1 = arith.constant 0 : i32
    return %c0_i32, %c0_i32_0 : i32, i32
  }
  func.func @transform_1(%arg0: i32) -> (i32, i32) {
    %c0_i32 = arith.constant 0 : i32
    %c0_i32_0 = arith.constant 0 : i32
    return %c0_i32, %arg0 : i32, i32
  }
  func.func @transform_2(%arg0: i32) -> (i32, i32) {
    %c0_i32 = arith.constant 0 : i32
    %c0_i32_0 = arith.constant 0 : i32
    return %c0_i32, %arg0 : i32, i32
  }
  func.func @transform_3(%arg0: i32) -> (i32, i32) {
    %c0_i32 = arith.constant 0 : i32
    %c0_i32_0 = arith.constant 0 : i32
    return %c0_i32, %arg0 : i32, i32
  }
}

</mosaic_0001>

<bundles_post_ra>
// kernel: tpu_custom_call.1
= control target key start
LH: loop header
LB: loop body
LE: loop exit
PB: predicated region body
PF: predicated region fallthrough
CT: control target
= control target key end

     0   :  { %8 = vsyncpa [#allocation3], 0  ;;  %s401_s0 = inlined_call_operand.hbm [shape: bf16[8,128], index: 0, kind: input, shape index: {}]   ;;  %s402_s1 = inlined_call_operand.hbm [shape: bf16[128,128], index: 1, kind: input, shape index: {}]   ;;  %s403_s2 = inlined_call_operand.vmem [shape: f32[2,128], index: 2, kind: input, shape index: {}]   ;;  %s404_s3 = inlined_call_operand.hbm [shape: f32[8,128], index: 3, kind: output, shape index: {}]  }
   0x1   :  { %9 = vsyncpa [#allocation6], 0 }
   0x2   :  { %10 = vsyncpa [#allocation4], 0  ;;  %s328_s12 = smov [#allocation2]   ;;  %s329_s14 = smov [#allocation5]  }
   0x3   :  { %s17_s13 = sshll.u32 %s328_s12, 4  ;;  %s26_s15 = sshll.u32 %s329_s14, 4  ;;  %s18_s13 = int_to_ptr.vmem [resolvable:$true] %s17_s13  ;;  %s355_s15 = int_to_ptr.vmem [resolvable:$true] %s26_s15 }
   0x4   :  { %s256_s18 = scalar_lea.hbm %s401_s0, 64 }
   0x5   :  { %p257_p0 = scmp.ne.s32.totalorder %s401_s0, %s256_s18  ;;  %p260_p1 = scmp.lt.u32.totalorder %s256_s18, %s401_s0 }
   0x7   :  { %p262_p2 = pnand %p260_p1, %p257_p0 }
   0x9   :  { %265 = shalt.err (!%p262_p2)
}
   0xa   :  { %s266_s23 = scalar_lea.vmem %s18_s13, 64  ;;  %p271_p4 = scmp.lt.s32.totalorder %s18_s13, %s18_s13 }
   0xb   :  { %p267_p3 = scmp.ne.s32.totalorder %s18_s13, %s266_s23  ;;  %p272_p5 = scmp.lt.s32.totalorder %s266_s23, %s266_s23 }
   0xd   :  { %p273_p6 = por %p272_p5, %p271_p4 }
   0xf   :  { %p274_p7 = pnand %p273_p6, %p267_p3 }
  0x11   :  { %277 = shalt.err (!%p274_p7)
}
  0x12   :  { %20 = dma.hbm_to_vmem [thread:$0]  %s401_s0, 64, %s18_s13, [#allocation3]  }
  0x13   :  { %s278_s28 = scalar_lea.hbm %s402_s1, 1024 }
  0x14   :  { %p279_p8 = scmp.ne.s32.totalorder %s402_s1, %s278_s28  ;;  %p282_p9 = scmp.lt.u32.totalorder %s278_s28, %s402_s1 }
  0x16   :  { %p284_p10 = pnand %p282_p9, %p279_p8 }
  0x18   :  { %287 = shalt.err (!%p284_p10)
}
  0x19   :  { %s288_s6 = scalar_lea.vmem %s355_s15, 1024  ;;  %p293_p12 = scmp.lt.s32.totalorder %s355_s15, %s355_s15 }
  0x1a   :  { %p289_p11 = scmp.ne.s32.totalorder %s355_s15, %s288_s6  ;;  %p294_p13 = scmp.lt.s32.totalorder %s288_s6, %s288_s6 }
  0x1c   :  { %p295_p0 = por %p294_p13, %p293_p12 }
  0x1e   :  { %p296_p1 = pnand %p295_p0, %p289_p11 }
  0x20   :  { %299 = shalt.err (!%p296_p1)
}
  0x21   :  { %s330_s0 = smov 64   ;;  %s331_s7 = smov 4  }
  0x22   :  { %32 = dma.hbm_to_vmem [thread:$0]  %s402_s1, 1024, %s355_s15, [#allocation6], %s330_s0, %s330_s0, %s331_s7  }
  0x23   :  { %322 = dma.done.wait [#allocation3], 64  }
  0x24   :  { %323 = vsyncadd [#allocation3], 4294967232 }
  0x25   :  { %324 = dma.done.wait [#allocation6], 1024  }
  0x26   :  { %325 = vsyncadd [#allocation6], 4294966272  ;;  %v332_v0 = vmov 0.0   ;;  %vm333_vm0 = vmmov 0   ;;  %v246_v1 = vld [vmem:[#allocation5] sm:$0xff]   ;;  %v247_v2 = vld [vmem:[#allocation5 + $0x8] sm:$0xff]   ;;  %v174_v33 = vlaneseq }
  0x27   :  { %219 = vmatprep.subr.bf16.mxu0 %v332_v0  ;;  %235 = vmatprep.mubr.msk.bf16.mxu0 %vm333_vm0, %v332_v0  ;;  %v248_v3 = vld [vmem:[#allocation5 + $0x10] sm:$0xff]   ;;  %v249_v4 = vld [vmem:[#allocation5 + $0x18] sm:$0xff]   ;;  %v250_v5 = vld [vmem:[#allocation5 + $0x20] sm:$0xff]   ;;  %s334_s11 = smov [#allocation7]  }
  0x28   :  { %220 = vmatpush3.bf16.msra.mxu0 %v246_v1  ;;  %v251_v6 = vld [vmem:[#allocation5 + $0x28] sm:$0xff]   ;;  %v252_v7 = vld [vmem:[#allocation5 + $0x30] sm:$0xff]   ;;  %v253_v8 = vld [vmem:[#allocation5 + $0x38] sm:$0xff]   ;;  %v175_v34 = vshrl.u32 %v174_v33, 7  ;;  %s192_s12 = sshll.u32 %s334_s11, 4  ;;  %s193_s12 = int_to_ptr.vmem [resolvable:$true] %s192_s12 }
  0x29   :  { %221 = vmatprep.subr.bf16.mxu0 %v332_v0  ;;  %v42_v9 = vld [vmem:[#allocation2] sm:$0xf]  ;;  %s300_s13 = scalar_lea.vmem %s193_s12, 128  ;;  %p305_p3 = scmp.lt.s32.totalorder %s193_s12, %s193_s12 }
  0x2a   :  { %v165_v35 = vld [vmem:[%s403_s2] sm:$0x3]  ;;  %v176_v38 = vsub.s32 0, %v175_v34  ;;  %v181_v42 = vsub.s32 1, %v175_v34  ;;  %p301_p2 = scmp.ne.s32.totalorder %s193_s12, %s300_s13  ;;  %p306_p4 = scmp.lt.s32.totalorder %s300_s13, %s300_s13 }
  0x2c   :  { %222 = vmatpush3.bf16.msra.mxu0 %v247_v2  ;;  %p307_p5 = por %p306_p4, %p305_p3 }
  0x2d   :  { %223 = vmatprep.subr.bf16.mxu0 %v332_v0 }
  0x2e   :  { %p308_p6 = pnand %p307_p5, %p301_p2 }
  0x30   :  { %224 = vmatpush3.bf16.msra.mxu0 %v248_v3 }
  0x31   :  { %225 = vmatprep.subr.bf16.mxu0 %v332_v0 }
  0x34   :  { %226 = vmatpush3.bf16.msra.mxu0 %v249_v4 }
  0x35   :  { %227 = vmatprep.subr.bf16.mxu0 %v332_v0 }
  0x38   :  { %228 = vmatpush3.bf16.msra.mxu0 %v250_v5 }
  0x39   :  { %229 = vmatprep.subr.bf16.mxu0 %v332_v0 }
  0x3c   :  { %230 = vmatpush3.bf16.msra.mxu0 %v251_v6 }
  0x3d   :  { %231 = vmatprep.subr.bf16.mxu0 %v332_v0 }
  0x40   :  { %232 = vmatpush3.bf16.msra.mxu0 %v252_v7 }
  0x41   :  { %233 = vmatprep.subr.bf16.mxu0 %v332_v0 }
  0x44   :  { %234 = vmatpush3.bf16.msra.mxu0 %v253_v8 }
  0x47   :  { %236 = vmatmul.mubr.bf16.vlgmr.msra.gmra.mrb[0].mxu0 %v42_v9 }
 0x11a   :  { %v141_v10 = vpop.f32.mrb[0].mxu0 }
 0x11b   :  { %v147_v11 = vrot.slane %v141_v10, 4  ;;  %v153_v12 = vmul.f32 %v141_v10, %v141_v10  ;;  %v237_v13 = vpop.f32.mrb[1].mxu0 }
 0x11c   :  { %v144_v14 = vpop.f32.mrb[2].mxu0 }
 0x11d   :  { %v148_v15 = vadd.f32 %v147_v11, %v141_v10  ;;  %v154_v16 = vrot.slane %v153_v12, 4  ;;  %v238_v17 = vpop.f32.mrb[3].mxu0 }
 0x11f   :  { %v149_v18 = vrot.slane %v148_v15, 2  ;;  %v155_v19 = vadd.f32 %v154_v16, %v153_v12 }
 0x121   :  { %v150_v20 = vadd.f32 %v149_v18, %v148_v15  ;;  %v156_v21 = vrot.slane %v155_v19, 2 }
 0x123   :  { %v151_v22 = vrot.slane %v150_v20, 1  ;;  %v157_v23 = vadd.f32 %v156_v21, %v155_v19 }
 0x125   :  { %v152_v24 = vadd.f32 %v151_v22, %v150_v20  ;;  %v158_v25 = vrot.slane %v157_v23, 1 }
 0x127   :  { %v159_v26 = vadd.f32 %v158_v25, %v157_v23  ;;  %v160_v27 = vmul.f32 0.125, %v152_v24 }
 0x129   :  { %v161_v28 = vmul.f32 0.125, %v159_v26  ;;  %v162_v29 = vmul.f32 %v160_v27, %v160_v27 }
 0x12b   :  { %v163_v30 = vsub.f32 %v161_v28, %v162_v29 }
 0x12d   :  { %v164_v31 = vmax.f32 %v163_v30, 0.0 }
 0x12f   :  { %v166_v32 = vadd.f32 1e-05, %v164_v31 }
 0x131   :  { %254 = vrsqrt.f32 %v166_v32 }
 0x13b   :  { %v255_v36 = vpop.eup %254 }
 0x13c   :  { %v168_v37 = vmul.f32 %v255_v36, %v165_v35 }
 0x13e   :  { %v169_v39 = vmul.f32 %v168_v37, %v160_v27  ;;  %v177_v40 = vrot.slane %v168_v37, %v176_v38 }
 0x140   :  { %v171_v41 = vrot.slane %v169_v39, 7  ;;  %v178_v44 = vmul.f32 %v177_v40, %v141_v10 }
 0x142   :  { %v173_v43 = vsub.f32 %v165_v35, %v171_v41 }
 0x144   :  { %v182_v45 = vrot.slane %v173_v43, %v181_v42 }
 0x146   :  { %v183_v46 = vadd.f32 %v182_v45, %v178_v44 }
 0x148   :  { %v184_v47 = vmax.f32 %v183_v46, 0.0 }
 0x14a   :  { %185 = vst [vmem:[#allocation7] sm:$0xff] %v184_v47 }
 0x14b   :  { %311 = shalt.err (!%p308_p6)
}
 0x14c   :  { %s312_s15 = scalar_lea.hbm %s404_s3, 128 }
 0x14d   :  { %p313_p7 = scmp.ne.s32.totalorder %s404_s3, %s312_s15  ;;  %p316_p8 = scmp.lt.u32.totalorder %s312_s15, %s404_s3 }
 0x14f   :  { %p318_p9 = pnand %p316_p8, %p313_p7 }
 0x151   :  { %321 = shalt.err (!%p318_p9)
}
 0x152   :  { %195 = dma.vmem_to_hbm [thread:$0]  %s193_s12, 128, %s404_s3, [#allocation4]  }
 0x153   :  { %326 = dma.done.wait [#allocation4], 128  }
 0x154   :  { %327 = vsyncadd [#allocation4], 4294967168 }
 0x155   :  { %199 = vsyncpa [#allocation3], 1 }
 0x156   :  { %200 = vsyncpa [#allocation6], 1 }
 0x157   :  { %201 = vsyncpa [#allocation4], 1 }

</bundles_post_ra>
